<compile_context>
chip_gen: v5e
topology: v5e:2x2
jax: 0.10.0
libtpu: 0.0.40
codegen_flags: <defaults>
</compile_context>

<pallas_src>
import math
import functools

import jax
import jax.numpy as jnp
from jax.experimental import pallas as pl
from jax.experimental.pallas import tpu as pltpu


# ----------------------------------------------------------------------------
# Parameter setup (mirrors PositionalEncoding.__init__)
# ----------------------------------------------------------------------------
def make_positional_encoding_table(max_len, d_model, dtype=jnp.float32):
    position = jnp.arange(0, max_len, dtype=jnp.float32)[:, None]            # (L, 1)
    div_term = jnp.exp(
        jnp.arange(0, d_model, 2, dtype=jnp.float32) * (-math.log(10000.0) / d_model)
    )                                                                         # (D/2,)
    pe = jnp.zeros((max_len, d_model), dtype=jnp.float32)
    pe = pe.at[:, 0::2].set(jnp.sin(position * div_term))
    pe = pe.at[:, 1::2].set(jnp.cos(position * div_term))
    return pe.astype(dtype)                                                   # (L, D)


# ----------------------------------------------------------------------------
# Tile selection (keeps blocks layout-legal and inside the scoped-VMEM budget)
# ----------------------------------------------------------------------------
# ~2 MiB of f32 per operand block; with x + bits + out double-buffered this is
# ~12 MiB peak, comfortably under the 32 MiB default scoped VMEM on all gens.
_TARGET_BLOCK_ELEMS = 512 * 1024
_COL_TILE_CAP = 16384  # lanes per block


def _choose_col_tile(n_cols):
    # Last block dim must be a multiple of 128 or the full extent.
    if n_cols <= _COL_TILE_CAP:
        return n_cols                        # full extent: always legal
    return (_COL_TILE_CAP // 128) * 128      # lane-dense; edge block is masked


def _choose_row_tile(n_rows, col_tile):
    max_rows = max(1, _TARGET_BLOCK_ELEMS // col_tile)
    if n_rows <= max_rows:
        return n_rows                        # full extent: always legal
    return max(8, (max_rows // 8) * 8)       # multiple of 8; edge block is masked


# ----------------------------------------------------------------------------
# Kernels
# ----------------------------------------------------------------------------
def _pe_add_kernel(x_ref, pe_ref, o_ref):
    # x_ref/o_ref: (TILE_B, TILE_C); pe_ref: (1, TILE_C) broadcast over rows.
    o_ref[...] = x_ref[...] + pe_ref[...]


def _pe_add_dropout_kernel(threshold_u16, inv_keep, x_ref, pe_ref, bits_ref, o_ref):
    y = x_ref[...] + pe_ref[...]
    keep = bits_ref[...] >= jnp.uint16(threshold_u16)        # integer-domain compare
    scale = jnp.asarray(inv_keep, dtype=y.dtype)
    o_ref[...] = jnp.where(keep, y * scale, jnp.zeros_like(y))


# ----------------------------------------------------------------------------
# Wrapper (forward pass)
# ----------------------------------------------------------------------------
@functools.partial(jax.jit, static_argnames=("p", "training"))
def positional_encoding_forward(x, pe_table, key, *, p=0.1, training=False):
    """x: (B, S, D); pe_table: (max_len, D); key: jax PRNG key (used iff training)."""
    B, S, D = x.shape
    cols = S * D

    # Lane-dense view of x and the pe slice; pe is cast to x.dtype once here.
    # NOTE: for bf16 activations this adds in bf16 (PyTorch promotes to f32);
    # accepted as a minor numerical difference.
    x2 = x.reshape(B, cols)
    pe2 = pe_table[:S].astype(x.dtype).reshape(1, cols)

    tile_c = _choose_col_tile(cols)
    tile_b = _choose_row_tile(B, tile_c)
    n_c = pl.cdiv(cols, tile_c)
    n_b = pl.cdiv(B, tile_b)
    # Column tiles OUTER, batch tiles INNER -> the pe block index is constant
    # across the inner loop, so Pallas keeps the pe tile resident (no re-DMA).
    grid = (n_c, n_b)

    x_spec = pl.BlockSpec((tile_b, tile_c), lambda j, i: (i, j))
    pe_spec = pl.BlockSpec((1, tile_c), lambda j, i: (0, j))
    out_spec = pl.BlockSpec((tile_b, tile_c), lambda j, i: (i, j))
    cparams = pltpu.CompilerParams(
        dimension_semantics=("parallel", "parallel"),  # no carried state
    )
    out_shape = jax.ShapeDtypeStruct((B, cols), x.dtype)

    apply_dropout = bool(training) and p > 0.0
    if apply_dropout:
        # keep iff bits >= threshold; keep prob = 1 - p (quantized to 1/65536).
        threshold = min(max(int(round(p * 65536.0)), 0), 65535)
        inv_keep = 1.0 / (1.0 - p)
        bits = jax.random.bits(key, (B, cols), dtype=jnp.uint16)
        out2 = pl.pallas_call(
            functools.partial(_pe_add_dropout_kernel, threshold, inv_keep),
            out_shape=out_shape,
            grid=grid,
            in_specs=[x_spec, pe_spec, x_spec],
            out_specs=out_spec,
            compiler_params=cparams,
        )(x2, pe2, bits)
    else:
        out2 = pl.pallas_call(
            _pe_add_kernel,
            out_shape=out_shape,
            grid=grid,
            in_specs=[x_spec, pe_spec],
            out_specs=out_spec,
            compiler_params=cparams,
        )(x2, pe2)

    return out2.reshape(B, S, D)


# ----------------------------------------------------------------------------
# Demo / self-check
# ----------------------------------------------------------------------------
if __name__ == "__main__":
    key = jax.random.PRNGKey(0)
    kx, kdrop = jax.random.split(key)

    B, S, D = 2, 8, 32
    max_len = 64
    dropout_p = 0.1

    x = jax.random.normal(kx, (B, S, D), dtype=jnp.float32)
    pe_table = make_positional_encoding_table(max_len, D, dtype=jnp.float32)

    # --- eval mode (dropout is identity): exact semantics check -------------
    out_eval = positional_encoding_forward(x, pe_table, kdrop, p=dropout_p, training=False)
    out_eval = jax.block_until_ready(out_eval)
    ref_eval = x + pe_table[None, :S, :]
    assert out_eval.shape == (B, S, D)
    assert jnp.allclose(out_eval, ref_eval, atol=1e-6), "eval-mode mismatch"

    # --- training mode (inverted dropout) ------------------------------------
    out_train = positional_encoding_forward(x, pe_table, kdrop, p=dropout_p, training=True)
    out_train = jax.block_until_ready(out_train)
    assert out_train.shape == (B, S, D)
    # every element is either 0 (dropped) or (x+pe)/(1-p) (kept)
    scaled = ref_eval / (1.0 - dropout_p)
    is_zero = jnp.isclose(out_train, 0.0, atol=1e-6)
    is_kept = jnp.isclose(out_train, scaled, atol=1e-5, rtol=1e-5)
    assert bool(jnp.all(is_zero | is_kept)), "training-mode dropout semantics mismatch"

    print("KERNEL_OK")
</pallas_src>

<mosaic_0001>
module attributes {stable_mosaic.version = 11 : i64} {
  func.func @_pe_add_kernel(%arg0: i32, %arg1: i32, %arg2: memref<2x256xf32, #tpu.memory_space<vmem>>, %arg3: memref<1x256xf32, #tpu.memory_space<vmem>>, %arg4: memref<2x256xf32, #tpu.memory_space<vmem>>) attributes {dimension_semantics = [#tpu.dimension_semantics<parallel>, #tpu.dimension_semantics<parallel>], iteration_bounds = array<i64: 1, 1>, scalar_prefetch = 0 : i64, scratch_operands = 0 : i64, tpu.core_type = #tpu.core_type<tc>, window_params = [{transform_indices = @transform_0, window_bounds = array<i64: 2, 256>}, {transform_indices = @transform_1, window_bounds = array<i64: 1, 256>}, {transform_indices = @transform_2, window_bounds = array<i64: 2, 256>}]} {
    %c0 = arith.constant 0 : index
    %c0_0 = arith.constant 0 : index
    %0 = vector.load %arg2[%c0, %c0_0] : memref<2x256xf32, #tpu.memory_space<vmem>>, vector<2x256xf32>
    %c0_1 = arith.constant 0 : index
    %c0_2 = arith.constant 0 : index
    %1 = vector.load %arg3[%c0_1, %c0_2] : memref<1x256xf32, #tpu.memory_space<vmem>>, vector<1x256xf32>
    %2 = vector.broadcast %1 : vector<1x256xf32> to vector<2x256xf32>
    %3 = arith.addf %0, %2 : vector<2x256xf32>
    %c0_3 = arith.constant 0 : index
    %c0_4 = arith.constant 0 : index
    %4 = vector.load %arg4[%c0_3, %c0_4] : memref<2x256xf32, #tpu.memory_space<vmem>>, vector<2x256xf32>
    tpu.vector_store %arg4[%c0_3, %c0_4], %3 {strides = array<i32>} : memref<2x256xf32, #tpu.memory_space<vmem>>, vector<2x256xf32>,
    return
  }
  func.func @transform_0(%arg0: i32, %arg1: i32) -> (i32, i32) {
    %c0_i32 = arith.constant 0 : i32
    return %arg1, %arg0 : i32, i32
  }
  func.func @transform_1(%arg0: i32, %arg1: i32) -> (i32, i32) {
    %c0_i32 = arith.constant 0 : i32
    %c0_i32_0 = arith.constant 0 : i32
    return %c0_i32, %arg0 : i32, i32
  }
  func.func @transform_2(%arg0: i32, %arg1: i32) -> (i32, i32) {
    %c0_i32 = arith.constant 0 : i32
    return %arg1, %arg0 : i32, i32
  }
}

</mosaic_0001>

<bundles_post_ra>
// kernel: positional_encoding_forward.1
= control target key start
LH: loop header
LB: loop body
LE: loop exit
PB: predicated region body
PF: predicated region fallthrough
CT: control target
= control target key end

     0   :  { %vm17_vm0 = vcmask 1041408   ;;  %s50_s1 = inlined_call_operand.vmem [shape: f32[1,256], index: 1, kind: input, shape index: {}]   ;;  %s51_s0 = inlined_call_operand.vmem [shape: f32[2,256], index: 0, kind: input, shape index: {}]   ;;  %s52_s2 = inlined_call_operand.vmem [shape: f32[2,256], index: 2, kind: output, shape index: {}]  }
   0x1   :  { %v12_v0 = vld [vmem:[%s50_s1] sm:$0x3] }
   0x2   :  { %v14_v1 = vperm.slane %v12_v0, 0  ;;  %v15_v2 = vperm.slane %v12_v0, 1  ;;  %v11_v3 = vld [vmem:[%s51_s0] sm:$0xf] }
   0x4   :  { %v16_v4 = vrot.slane %v15_v2, 6 }
   0x6   :  { %v18_v5 = vsel %vm17_vm0, %v14_v1, %v16_v4 }
   0x7   :  { %v20_v6 = vadd.f32 %v18_v5, %v11_v3 }
   0x9   :  { %21 = vst [vmem:[%s52_s2] sm:$0xf] %v20_v6 }

</bundles_post_ra>
